<compile_context>
chip_gen: v5e
topology: v5e:2x2
jax: 0.10.0
libtpu: 0.0.40
codegen_flags: <defaults>
</compile_context>

<pallas_src>
import functools

import jax
import jax.numpy as jnp
from jax.experimental import pallas as pl
from jax.experimental.pallas import tpu as pltpu


def _round_up(n, m):
    return ((n + m - 1) // m) * m


def fastgrnn_classifier_kernel(zn_ref,      # SMEM (2,)           [zeta, nu]
                               x_ref,       # VMEM (T*Bt, I)      batch-tile slab, time-major
                               wT_ref,      # VMEM (I, Hp)        W^T   (H zero-padded)
                               uT_ref,      # VMEM (Hp, Hp)       U^T
                               bz_ref,      # VMEM (1, Hp)
                               bh_ref,      # VMEM (1, Hp)
                               fcwT_ref,    # VMEM (Hp, Cp)       fc W^T
                               fcb_ref,     # VMEM (1, Cp)
                               out_ref,     # VMEM (Bt, Cp)
                               pre_ref):    # VMEM scratch (T*Bt, Hp)
    TB, _ = x_ref.shape
    Hp = uT_ref.shape[0]
    Bt = out_ref.shape[0]
    T = TB // Bt

    zeta = zn_ref[0]
    s = zn_ref[0] + zn_ref[1]                      # zeta + nu (scalar, once)

    # Input projection for the whole sequence tile, hoisted off the serial path:
    # one (T*Bt, I) x (I, Hp) MXU matmul instead of T tiny 8-row matmuls.
    pre_ref[...] = jnp.dot(x_ref[...], wT_ref[...],
                           preferred_element_type=jnp.float32)

    # Hoist bias broadcasts out of the time loop (JAX does not CSE broadcast_in_dim).
    bz = jnp.broadcast_to(bz_ref[...], (Bt, Hp))
    bh = jnp.broadcast_to(bh_ref[...], (Bt, Hp))

    def step(t, h):
        row = pl.multiple_of(t * Bt, Bt)
        pre = pre_ref[pl.ds(row, Bt), :] + jnp.dot(
            h, uT_ref[...], preferred_element_type=jnp.float32)
        z_t = jax.nn.sigmoid(pre + bz)
        h_tilde = jnp.tanh(pre + bh)
        # zeta*(1 - z) + nu == (zeta + nu) - zeta*z
        return (s - zeta * z_t) * h_tilde + z_t * h

    h0 = jnp.zeros((Bt, Hp), jnp.float32)
    h_final = jax.lax.fori_loop(0, T, step, h0, unroll=min(T, 8))

    out_ref[...] = (jnp.dot(h_final, fcwT_ref[...],
                            preferred_element_type=jnp.float32)
                    + fcb_ref[...]).astype(out_ref.dtype)


def prepare_params(params):
    """One-time weight preparation (transpose / pad).  Keep OUT of the hot path."""
    W, U, b_z, b_h, zeta, nu, fc_w, fc_b = (
        params["W"], params["U"], params["b_z"], params["b_h"],
        params["zeta"], params["nu"], params["fc_w"], params["fc_b"])
    H, I = W.shape
    C = fc_w.shape[0]
    Hp = _round_up(H, 128)
    Cp = _round_up(C, 128)
    f32 = jnp.float32
    prepped = {
        "wT":      jnp.zeros((I, Hp), f32).at[:, :H].set(W.T.astype(f32)),
        "uT":      jnp.zeros((Hp, Hp), f32).at[:H, :H].set(U.T.astype(f32)),
        "bz":      jnp.zeros((1, Hp), f32).at[0, :H].set(b_z.astype(f32)),
        "bh":      jnp.zeros((1, Hp), f32).at[0, :H].set(b_h.astype(f32)),
        "fcwT":    jnp.zeros((Hp, Cp), f32).at[:H, :C].set(fc_w.T.astype(f32)),
        "fcb":     jnp.zeros((1, Cp), f32).at[0, :C].set(fc_b.astype(f32)),
        "zeta_nu": jnp.concatenate([zeta, nu]).astype(f32),
    }
    return jax.tree_util.tree_map(jnp.asarray, prepped), C


@functools.partial(jax.jit, static_argnames=("num_classes",))
def classifier_forward(x, prepped, *, num_classes):
    """x: (batch, seq_len, input_size) -> (batch, num_classes)."""
    B, T, I = x.shape
    Hp = prepped["uT"].shape[0]
    Cp = prepped["fcwT"].shape[1]
    assert T >= 1, "sequence length must be >= 1"

    # Batch tiling: sublane-dense tiles, >=2 grid steps for large batch so the
    # "parallel" grid axis can be split across TensorCores (v7x megacore).
    Bt = min(_round_up(B, 8), 128)
    Bp = _round_up(B, Bt)
    G = Bp // Bt

    f32 = jnp.float32
    # Pad batch only (I stays un-padded -> no 8x HBM blowup), then lay out each
    # batch tile as a contiguous, time-major (T*Bt, I) slab.
    x_p = jnp.zeros((Bp, T, I), f32).at[:B].set(x.astype(f32))
    x_p = x_p.reshape(G, Bt, T, I).transpose(0, 2, 1, 3).reshape(G * T * Bt, I)

    vmem = pltpu.MemorySpace.VMEM
    smem = pltpu.MemorySpace.SMEM
    out_p = pl.pallas_call(
        fastgrnn_classifier_kernel,
        out_shape=jax.ShapeDtypeStruct((Bp, Cp), jnp.float32),
        grid=(G,),
        in_specs=[
            pl.BlockSpec(memory_space=smem),                 # zeta/nu scalars
            pl.BlockSpec((T * Bt, I), lambda g: (g, 0)),     # x slab per batch tile
            pl.BlockSpec(memory_space=vmem),                 # W^T   (resident)
            pl.BlockSpec(memory_space=vmem),                 # U^T   (resident)
            pl.BlockSpec(memory_space=vmem),                 # b_z
            pl.BlockSpec(memory_space=vmem),                 # b_h
            pl.BlockSpec(memory_space=vmem),                 # fc W^T
            pl.BlockSpec(memory_space=vmem),                 # fc b
        ],
        out_specs=pl.BlockSpec((Bt, Cp), lambda g: (g, 0)),
        scratch_shapes=[pltpu.VMEM((T * Bt, Hp), jnp.float32)],   # pre_x scratch
        compiler_params=pltpu.CompilerParams(
            dimension_semantics=("parallel",),
            # Modest explicit budget: fits every generation (v7x has 64 MiB/TC);
            # demo footprint here is well under 1 MiB.
            vmem_limit_bytes=32 * 1024 * 1024),
    )(prepped["zeta_nu"], x_p, prepped["wT"], prepped["uT"],
      prepped["bz"], prepped["bh"], prepped["fcwT"], prepped["fcb"])

    return out_p[:B, :num_classes]


def reference_forward(x, params):
    """Pure-JAX reference mirroring the PyTorch forward."""
    W, U, b_z, b_h, zeta, nu, fc_w, fc_b = (
        params["W"], params["U"], params["b_z"], params["b_h"],
        params["zeta"], params["nu"], params["fc_w"], params["fc_b"])
    B, T, _ = x.shape
    H = W.shape[0]
    h = jnp.zeros((B, H), jnp.float32)
    for t in range(T):
        x_t = x[:, t, :]
        pre_z = x_t @ W.T + h @ U.T + b_z
        pre_h = x_t @ W.T + h @ U.T + b_h
        z_t = jax.nn.sigmoid(pre_z)
        h_tilde = jnp.tanh(pre_h)
        h = (zeta[0] * (1 - z_t) + nu[0]) * h_tilde + z_t * h
    return h @ fc_w.T + fc_b


def init_params(key, input_size, hidden_size, num_classes):
    stdv = 1.0 / (hidden_size ** 0.5)
    ks = jax.random.split(key, 8)
    u = lambda k, shape, s: jax.random.uniform(k, shape, jnp.float32, -s, s)
    fc_stdv = 1.0 / (hidden_size ** 0.5)
    return {
        "W":    u(ks[0], (hidden_size, input_size), stdv),
        "U":    u(ks[1], (hidden_size, hidden_size), stdv),
        "b_z":  u(ks[2], (hidden_size,), stdv),
        "b_h":  u(ks[3], (hidden_size,), stdv),
        "zeta": u(ks[4], (1,), stdv),
        "nu":   u(ks[5], (1,), stdv),
        "fc_w": u(ks[6], (num_classes, hidden_size), fc_stdv),
        "fc_b": u(ks[7], (num_classes,), fc_stdv),
    }


if __name__ == "__main__":
    batch, seq_len, input_size, hidden_size, num_classes = 2, 8, 16, 32, 4

    key = jax.random.PRNGKey(0)
    k_x, k_p = jax.random.split(key)
    x = jax.random.normal(k_x, (batch, seq_len, input_size), jnp.float32)
    params = init_params(k_p, input_size, hidden_size, num_classes)

    prepped, C = prepare_params(params)      # one-time weight prep (off hot path)
    out = classifier_forward(x, prepped, num_classes=C)
    out = jax.block_until_ready(out)

    ref = reference_forward(x, params)
    assert out.shape == (batch, num_classes)
    assert jnp.allclose(out, ref, atol=1e-5, rtol=1e-5), (out, ref)

    print("KERNEL_OK")
</pallas_src>

<mosaic_0001>
module attributes {stable_mosaic.version = 11 : i64} {
  func.func @fastgrnn_classifier_kernel(%arg0: i32, %arg1: memref<2xf32, #tpu.memory_space<smem>>, %arg2: memref<64x16xf32, #tpu.memory_space<vmem>>, %arg3: memref<16x128xf32, #tpu.memory_space<vmem>>, %arg4: memref<128x128xf32, #tpu.memory_space<vmem>>, %arg5: memref<1x128xf32, #tpu.memory_space<vmem>>, %arg6: memref<1x128xf32, #tpu.memory_space<vmem>>, %arg7: memref<128x128xf32, #tpu.memory_space<vmem>>, %arg8: memref<1x128xf32, #tpu.memory_space<vmem>>, %arg9: memref<8x128xf32, #tpu.memory_space<vmem>>, %arg10: memref<64x128xf32, #tpu.memory_space<vmem>>) attributes {dimension_semantics = [#tpu.dimension_semantics<parallel>], iteration_bounds = array<i64: 1>, scalar_prefetch = 0 : i64, scratch_operands = 1 : i64, tpu.core_type = #tpu.core_type<tc>, window_params = [{transform_indices = @transform_0, window_bounds = array<i64: 2>}, {transform_indices = @transform_1, window_bounds = array<i64: 64, 16>}, {pipeline_mode = #tpu.pipeline_mode<synchronous>, transform_indices = @transform_2, window_bounds = array<i64: 16, 128>}, {pipeline_mode = #tpu.pipeline_mode<synchronous>, transform_indices = @transform_3, window_bounds = array<i64: 128, 128>}, {pipeline_mode = #tpu.pipeline_mode<synchronous>, transform_indices = @transform_4, window_bounds = array<i64: 1, 128>}, {pipeline_mode = #tpu.pipeline_mode<synchronous>, transform_indices = @transform_5, window_bounds = array<i64: 1, 128>}, {pipeline_mode = #tpu.pipeline_mode<synchronous>, transform_indices = @transform_6, window_bounds = array<i64: 128, 128>}, {pipeline_mode = #tpu.pipeline_mode<synchronous>, transform_indices = @transform_7, window_bounds = array<i64: 1, 128>}, {transform_indices = @transform_8, window_bounds = array<i64: 8, 128>}]} {
    %c0 = arith.constant 0 : index
    %0 = memref.load %arg1[%c0] : memref<2xf32, #tpu.memory_space<smem>>
    %c0_0 = arith.constant 0 : index
    %1 = memref.load %arg1[%c0_0] : memref<2xf32, #tpu.memory_space<smem>>
    %c1 = arith.constant 1 : index
    %2 = memref.load %arg1[%c1] : memref<2xf32, #tpu.memory_space<smem>>
    %3 = arith.addf %1, %2 : f32
    %c0_1 = arith.constant 0 : index
    %c0_2 = arith.constant 0 : index
    %4 = vector.load %arg2[%c0_1, %c0_2] : memref<64x16xf32, #tpu.memory_space<vmem>>, vector<64x16xf32>
    %c0_3 = arith.constant 0 : index
    %c0_4 = arith.constant 0 : index
    %5 = vector.load %arg3[%c0_3, %c0_4] : memref<16x128xf32, #tpu.memory_space<vmem>>, vector<16x128xf32>
    %cst = arith.constant dense<0.000000e+00> : vector<64x128xf32>
    %6 = tpu.matmul %4, %5, %cst {dimension_numbers = #tpu.dot_dimension_numbers<[1], [0], [0], [1], [0, 0, 1, 1], [], []>} : vector<64x16xf32>, vector<16x128xf32>, vector<64x128xf32> -> vector<64x128xf32>
    %c0_5 = arith.constant 0 : index
    %c0_6 = arith.constant 0 : index
    %7 = vector.load %arg10[%c0_5, %c0_6] : memref<64x128xf32, #tpu.memory_space<vmem>>, vector<64x128xf32>
    tpu.vector_store %arg10[%c0_5, %c0_6], %6 {strides = array<i32>} : memref<64x128xf32, #tpu.memory_space<vmem>>, vector<64x128xf32>,
    %c0_7 = arith.constant 0 : index
    %c0_8 = arith.constant 0 : index
    %8 = vector.load %arg5[%c0_7, %c0_8] : memref<1x128xf32, #tpu.memory_space<vmem>>, vector<1x128xf32>
    %9 = vector.shape_cast %8 : vector<1x128xf32> to vector<1x128xf32>
    %10 = vector.broadcast %9 : vector<1x128xf32> to vector<8x128xf32>
    %c0_9 = arith.constant 0 : index
    %c0_10 = arith.constant 0 : index
    %11 = vector.load %arg6[%c0_9, %c0_10] : memref<1x128xf32, #tpu.memory_space<vmem>>, vector<1x128xf32>
    %12 = vector.shape_cast %11 : vector<1x128xf32> to vector<1x128xf32>
    %13 = vector.broadcast %12 : vector<1x128xf32> to vector<8x128xf32>
    %cst_11 = arith.constant 0.000000e+00 : f32
    %14 = vector.broadcast %cst_11 : f32 to vector<8x128xf32>
    %c0_i32 = arith.constant 0 : i32
    %c8_i32 = arith.constant 8 : i32
    %15 = arith.muli %c0_i32, %c8_i32 : i32
    %16 = tpu.assume_multiple %15, 8 : i32
    %17 = arith.index_cast %16 : i32 to index
    %c0_12 = arith.constant 0 : index
    %18 = vector.load %arg10[%17, %c0_12] : memref<64x128xf32, #tpu.memory_space<vmem>>, vector<8x128xf32>
    %c0_13 = arith.constant 0 : index
    %c0_14 = arith.constant 0 : index
    %19 = vector.load %arg4[%c0_13, %c0_14] : memref<128x128xf32, #tpu.memory_space<vmem>>, vector<128x128xf32>
    %cst_15 = arith.constant dense<0.000000e+00> : vector<8x128xf32>
    %20 = tpu.matmul %14, %19, %cst_15 {dimension_numbers = #tpu.dot_dimension_numbers<[1], [0], [0], [1], [0, 0, 1, 1], [], []>} : vector<8x128xf32>, vector<128x128xf32>, vector<8x128xf32> -> vector<8x128xf32>
    %21 = arith.addf %18, %20 : vector<8x128xf32>
    %22 = arith.addf %21, %10 : vector<8x128xf32>
    %23 = arith.negf %22 : vector<8x128xf32>
    %24 = math.exp %23 : vector<8x128xf32>
    %cst_16 = arith.constant 1.000000e+00 : f32
    %25 = vector.broadcast %cst_16 : f32 to vector<8x128xf32>
    %26 = arith.addf %25, %24 : vector<8x128xf32>
    %27 = arith.divf %25, %26 : vector<8x128xf32>
    %28 = arith.addf %21, %13 : vector<8x128xf32>
    %29 = math.tanh %28 : vector<8x128xf32>
    %30 = vector.broadcast %0 : f32 to vector<8x128xf32>
    %31 = arith.mulf %30, %27 : vector<8x128xf32>
    %32 = vector.broadcast %3 : f32 to vector<8x128xf32>
    %33 = arith.subf %32, %31 : vector<8x128xf32>
    %34 = arith.mulf %33, %29 : vector<8x128xf32>
    %35 = arith.mulf %27, %14 : vector<8x128xf32>
    %36 = arith.addf %34, %35 : vector<8x128xf32>
    %c1_i32 = arith.constant 1 : i32
    %c8_i32_17 = arith.constant 8 : i32
    %37 = arith.muli %c1_i32, %c8_i32_17 : i32
    %38 = tpu.assume_multiple %37, 8 : i32
    %39 = arith.index_cast %38 : i32 to index
    %c0_18 = arith.constant 0 : index
    %40 = vector.load %arg10[%39, %c0_18] : memref<64x128xf32, #tpu.memory_space<vmem>>, vector<8x128xf32>
    %c0_19 = arith.constant 0 : index
    %c0_20 = arith.constant 0 : index
    %41 = vector.load %arg4[%c0_19, %c0_20] : memref<128x128xf32, #tpu.memory_space<vmem>>, vector<128x128xf32>
    %cst_21 = arith.constant dense<0.000000e+00> : vector<8x128xf32>
    %42 = tpu.matmul %36, %41, %cst_21 {dimension_numbers = #tpu.dot_dimension_numbers<[1], [0], [0], [1], [0, 0, 1, 1], [], []>} : vector<8x128xf32>, vector<128x128xf32>, vector<8x128xf32> -> vector<8x128xf32>
    %43 = arith.addf %40, %42 : vector<8x128xf32>
    %44 = arith.addf %43, %10 : vector<8x128xf32>
    %45 = arith.negf %44 : vector<8x128xf32>
    %46 = math.exp %45 : vector<8x128xf32>
    %cst_22 = arith.constant 1.000000e+00 : f32
    %47 = vector.broadcast %cst_22 : f32 to vector<8x128xf32>
    %48 = arith.addf %47, %46 : vector<8x128xf32>
    %49 = arith.divf %47, %48 : vector<8x128xf32>
    %50 = arith.addf %43, %13 : vector<8x128xf32>
    %51 = math.tanh %50 : vector<8x128xf32>
    %52 = vector.broadcast %0 : f32 to vector<8x128xf32>
    %53 = arith.mulf %52, %49 : vector<8x128xf32>
    %54 = vector.broadcast %3 : f32 to vector<8x128xf32>
    %55 = arith.subf %54, %53 : vector<8x128xf32>
    %56 = arith.mulf %55, %51 : vector<8x128xf32>
    %57 = arith.mulf %49, %36 : vector<8x128xf32>
    %58 = arith.addf %56, %57 : vector<8x128xf32>
    %c2_i32 = arith.constant 2 : i32
    %c8_i32_23 = arith.constant 8 : i32
    %59 = arith.muli %c2_i32, %c8_i32_23 : i32
    %60 = tpu.assume_multiple %59, 8 : i32
    %61 = arith.index_cast %60 : i32 to index
    %c0_24 = arith.constant 0 : index
    %62 = vector.load %arg10[%61, %c0_24] : memref<64x128xf32, #tpu.memory_space<vmem>>, vector<8x128xf32>
    %c0_25 = arith.constant 0 : index
    %c0_26 = arith.constant 0 : index
    %63 = vector.load %arg4[%c0_25, %c0_26] : memref<128x128xf32, #tpu.memory_space<vmem>>, vector<128x128xf32>
    %cst_27 = arith.constant dense<0.000000e+00> : vector<8x128xf32>
    %64 = tpu.matmul %58, %63, %cst_27 {dimension_numbers = #tpu.dot_dimension_numbers<[1], [0], [0], [1], [0, 0, 1, 1], [], []>} : vector<8x128xf32>, vector<128x128xf32>, vector<8x128xf32> -> vector<8x128xf32>
    %65 = arith.addf %62, %64 : vector<8x128xf32>
    %66 = arith.addf %65, %10 : vector<8x128xf32>
    %67 = arith.negf %66 : vector<8x128xf32>
    %68 = math.exp %67 : vector<8x128xf32>
    %cst_28 = arith.constant 1.000000e+00 : f32
    %69 = vector.broadcast %cst_28 : f32 to vector<8x128xf32>
    %70 = arith.addf %69, %68 : vector<8x128xf32>
    %71 = arith.divf %69, %70 : vector<8x128xf32>
    %72 = arith.addf %65, %13 : vector<8x128xf32>
    %73 = math.tanh %72 : vector<8x128xf32>
    %74 = vector.broadcast %0 : f32 to vector<8x128xf32>
    %75 = arith.mulf %74, %71 : vector<8x128xf32>
    %76 = vector.broadcast %3 : f32 to vector<8x128xf32>
    %77 = arith.subf %76, %75 : vector<8x128xf32>
    %78 = arith.mulf %77, %73 : vector<8x128xf32>
    %79 = arith.mulf %71, %58 : vector<8x128xf32>
    %80 = arith.addf %78, %79 : vector<8x128xf32>
    %c3_i32 = arith.constant 3 : i32
    %c8_i32_29 = arith.constant 8 : i32
    %81 = arith.muli %c3_i32, %c8_i32_29 : i32
    %82 = tpu.assume_multiple %81, 8 : i32
    %83 = arith.index_cast %82 : i32 to index
    %c0_30 = arith.constant 0 : index
    %84 = vector.load %arg10[%83, %c0_30] : memref<64x128xf32, #tpu.memory_space<vmem>>, vector<8x128xf32>
    %c0_31 = arith.constant 0 : index
    %c0_32 = arith.constant 0 : index
    %85 = vector.load %arg4[%c0_31, %c0_32] : memref<128x128xf32, #tpu.memory_space<vmem>>, vector<128x128xf32>
    %cst_33 = arith.constant dense<0.000000e+00> : vector<8x128xf32>
    %86 = tpu.matmul %80, %85, %cst_33 {dimension_numbers = #tpu.dot_dimension_numbers<[1], [0], [0], [1], [0, 0, 1, 1], [], []>} : vector<8x128xf32>, vector<128x128xf32>, vector<8x128xf32> -> vector<8x128xf32>
    %87 = arith.addf %84, %86 : vector<8x128xf32>
    %88 = arith.addf %87, %10 : vector<8x128xf32>
    %89 = arith.negf %88 : vector<8x128xf32>
    %90 = math.exp %89 : vector<8x128xf32>
    %cst_34 = arith.constant 1.000000e+00 : f32
    %91 = vector.broadcast %cst_34 : f32 to vector<8x128xf32>
    %92 = arith.addf %91, %90 : vector<8x128xf32>
    %93 = arith.divf %91, %92 : vector<8x128xf32>
    %94 = arith.addf %87, %13 : vector<8x128xf32>
    %95 = math.tanh %94 : vector<8x128xf32>
    %96 = vector.broadcast %0 : f32 to vector<8x128xf32>
    %97 = arith.mulf %96, %93 : vector<8x128xf32>
    %98 = vector.broadcast %3 : f32 to vector<8x128xf32>
    %99 = arith.subf %98, %97 : vector<8x128xf32>
    %100 = arith.mulf %99, %95 : vector<8x128xf32>
    %101 = arith.mulf %93, %80 : vector<8x128xf32>
    %102 = arith.addf %100, %101 : vector<8x128xf32>
    %c4_i32 = arith.constant 4 : i32
    %c8_i32_35 = arith.constant 8 : i32
    %103 = arith.muli %c4_i32, %c8_i32_35 : i32
    %104 = tpu.assume_multiple %103, 8 : i32
    %105 = arith.index_cast %104 : i32 to index
    %c0_36 = arith.constant 0 : index
    %106 = vector.load %arg10[%105, %c0_36] : memref<64x128xf32, #tpu.memory_space<vmem>>, vector<8x128xf32>
    %c0_37 = arith.constant 0 : index
    %c0_38 = arith.constant 0 : index
    %107 = vector.load %arg4[%c0_37, %c0_38] : memref<128x128xf32, #tpu.memory_space<vmem>>, vector<128x128xf32>
    %cst_39 = arith.constant dense<0.000000e+00> : vector<8x128xf32>
    %108 = tpu.matmul %102, %107, %cst_39 {dimension_numbers = #tpu.dot_dimension_numbers<[1], [0], [0], [1], [0, 0, 1, 1], [], []>} : vector<8x128xf32>, vector<128x128xf32>, vector<8x128xf32> -> vector<8x128xf32>
    %109 = arith.addf %106, %108 : vector<8x128xf32>
    %110 = arith.addf %109, %10 : vector<8x128xf32>
    %111 = arith.negf %110 : vector<8x128xf32>
    %112 = math.exp %111 : vector<8x128xf32>
    %cst_40 = arith.constant 1.000000e+00 : f32
    %113 = vector.broadcast %cst_40 : f32 to vector<8x128xf32>
    %114 = arith.addf %113, %112 : vector<8x128xf32>
    %115 = arith.divf %113, %114 : vector<8x128xf32>
    %116 = arith.addf %109, %13 : vector<8x128xf32>
    %117 = math.tanh %116 : vector<8x128xf32>
    %118 = vector.broadcast %0 : f32 to vector<8x128xf32>
    %119 = arith.mulf %118, %115 : vector<8x128xf32>
    %120 = vector.broadcast %3 : f32 to vector<8x128xf32>
    %121 = arith.subf %120, %119 : vector<8x128xf32>
    %122 = arith.mulf %121, %117 : vector<8x128xf32>
    %123 = arith.mulf %115, %102 : vector<8x128xf32>
    %124 = arith.addf %122, %123 : vector<8x128xf32>
    %c5_i32 = arith.constant 5 : i32
    %c8_i32_41 = arith.constant 8 : i32
    %125 = arith.muli %c5_i32, %c8_i32_41 : i32
    %126 = tpu.assume_multiple %125, 8 : i32
    %127 = arith.index_cast %126 : i32 to index
    %c0_42 = arith.constant 0 : index
    %128 = vector.load %arg10[%127, %c0_42] : memref<64x128xf32, #tpu.memory_space<vmem>>, vector<8x128xf32>
    %c0_43 = arith.constant 0 : index
    %c0_44 = arith.constant 0 : index
    %129 = vector.load %arg4[%c0_43, %c0_44] : memref<128x128xf32, #tpu.memory_space<vmem>>, vector<128x128xf32>
    %cst_45 = arith.constant dense<0.000000e+00> : vector<8x128xf32>
    %130 = tpu.matmul %124, %129, %cst_45 {dimension_numbers = #tpu.dot_dimension_numbers<[1], [0], [0], [1], [0, 0, 1, 1], [], []>} : vector<8x128xf32>, vector<128x128xf32>, vector<8x128xf32> -> vector<8x128xf32>
    %131 = arith.addf %128, %130 : vector<8x128xf32>
    %132 = arith.addf %131, %10 : vector<8x128xf32>
    %133 = arith.negf %132 : vector<8x128xf32>
    %134 = math.exp %133 : vector<8x128xf32>
    %cst_46 = arith.constant 1.000000e+00 : f32
    %135 = vector.broadcast %cst_46 : f32 to vector<8x128xf32>
    %136 = arith.addf %135, %134 : vector<8x128xf32>
    %137 = arith.divf %135, %136 : vector<8x128xf32>
    %138 = arith.addf %131, %13 : vector<8x128xf32>
    %139 = math.tanh %138 : vector<8x128xf32>
    %140 = vector.broadcast %0 : f32 to vector<8x128xf32>
    %141 = arith.mulf %140, %137 : vector<8x128xf32>
    %142 = vector.broadcast %3 : f32 to vector<8x128xf32>
    %143 = arith.subf %142, %141 : vector<8x128xf32>
    %144 = arith.mulf %143, %139 : vector<8x128xf32>
    %145 = arith.mulf %137, %124 : vector<8x128xf32>
    %146 = arith.addf %144, %145 : vector<8x128xf32>
    %c6_i32 = arith.constant 6 : i32
    %c8_i32_47 = arith.constant 8 : i32
    %147 = arith.muli %c6_i32, %c8_i32_47 : i32
    %148 = tpu.assume_multiple %147, 8 : i32
    %149 = arith.index_cast %148 : i32 to index
    %c0_48 = arith.constant 0 : index
    %150 = vector.load %arg10[%149, %c0_48] : memref<64x128xf32, #tpu.memory_space<vmem>>, vector<8x128xf32>
    %c0_49 = arith.constant 0 : index
    %c0_50 = arith.constant 0 : index
    %151 = vector.load %arg4[%c0_49, %c0_50] : memref<128x128xf32, #tpu.memory_space<vmem>>, vector<128x128xf32>
    %cst_51 = arith.constant dense<0.000000e+00> : vector<8x128xf32>
    %152 = tpu.matmul %146, %151, %cst_51 {dimension_numbers = #tpu.dot_dimension_numbers<[1], [0], [0], [1], [0, 0, 1, 1], [], []>} : vector<8x128xf32>, vector<128x128xf32>, vector<8x128xf32> -> vector<8x128xf32>
    %153 = arith.addf %150, %152 : vector<8x128xf32>
    %154 = arith.addf %153, %10 : vector<8x128xf32>
    %155 = arith.negf %154 : vector<8x128xf32>
    %156 = math.exp %155 : vector<8x128xf32>
    %cst_52 = arith.constant 1.000000e+00 : f32
    %157 = vector.broadcast %cst_52 : f32 to vector<8x128xf32>
    %158 = arith.addf %157, %156 : vector<8x128xf32>
    %159 = arith.divf %157, %158 : vector<8x128xf32>
    %160 = arith.addf %153, %13 : vector<8x128xf32>
    %161 = math.tanh %160 : vector<8x128xf32>
    %162 = vector.broadcast %0 : f32 to vector<8x128xf32>
    %163 = arith.mulf %162, %159 : vector<8x128xf32>
    %164 = vector.broadcast %3 : f32 to vector<8x128xf32>
    %165 = arith.subf %164, %163 : vector<8x128xf32>
    %166 = arith.mulf %165, %161 : vector<8x128xf32>
    %167 = arith.mulf %159, %146 : vector<8x128xf32>
    %168 = arith.addf %166, %167 : vector<8x128xf32>
    %c7_i32 = arith.constant 7 : i32
    %c8_i32_53 = arith.constant 8 : i32
    %169 = arith.muli %c7_i32, %c8_i32_53 : i32
    %170 = tpu.assume_multiple %169, 8 : i32
    %171 = arith.index_cast %170 : i32 to index
    %c0_54 = arith.constant 0 : index
    %172 = vector.load %arg10[%171, %c0_54] : memref<64x128xf32, #tpu.memory_space<vmem>>, vector<8x128xf32>
    %c0_55 = arith.constant 0 : index
    %c0_56 = arith.constant 0 : index
    %173 = vector.load %arg4[%c0_55, %c0_56] : memref<128x128xf32, #tpu.memory_space<vmem>>, vector<128x128xf32>
    %cst_57 = arith.constant dense<0.000000e+00> : vector<8x128xf32>
    %174 = tpu.matmul %168, %173, %cst_57 {dimension_numbers = #tpu.dot_dimension_numbers<[1], [0], [0], [1], [0, 0, 1, 1], [], []>} : vector<8x128xf32>, vector<128x128xf32>, vector<8x128xf32> -> vector<8x128xf32>
    %175 = arith.addf %172, %174 : vector<8x128xf32>
    %176 = arith.addf %175, %10 : vector<8x128xf32>
    %177 = arith.negf %176 : vector<8x128xf32>
    %178 = math.exp %177 : vector<8x128xf32>
    %cst_58 = arith.constant 1.000000e+00 : f32
    %179 = vector.broadcast %cst_58 : f32 to vector<8x128xf32>
    %180 = arith.addf %179, %178 : vector<8x128xf32>
    %181 = arith.divf %179, %180 : vector<8x128xf32>
    %182 = arith.addf %175, %13 : vector<8x128xf32>
    %183 = math.tanh %182 : vector<8x128xf32>
    %184 = vector.broadcast %0 : f32 to vector<8x128xf32>
    %185 = arith.mulf %184, %181 : vector<8x128xf32>
    %186 = vector.broadcast %3 : f32 to vector<8x128xf32>
    %187 = arith.subf %186, %185 : vector<8x128xf32>
    %188 = arith.mulf %187, %183 : vector<8x128xf32>
    %189 = arith.mulf %181, %168 : vector<8x128xf32>
    %190 = arith.addf %188, %189 : vector<8x128xf32>
    %c8_i32_59 = arith.constant 8 : i32
    %c0_60 = arith.constant 0 : index
    %c0_61 = arith.constant 0 : index
    %191 = vector.load %arg7[%c0_60, %c0_61] : memref<128x128xf32, #tpu.memory_space<vmem>>, vector<128x128xf32>
    %cst_62 = arith.constant dense<0.000000e+00> : vector<8x128xf32>
    %192 = tpu.matmul %190, %191, %cst_62 {dimension_numbers = #tpu.dot_dimension_numbers<[1], [0], [0], [1], [0, 0, 1, 1], [], []>} : vector<8x128xf32>, vector<128x128xf32>, vector<8x128xf32> -> vector<8x128xf32>
    %c0_63 = arith.constant 0 : index
    %c0_64 = arith.constant 0 : index
    %193 = vector.load %arg8[%c0_63, %c0_64] : memref<1x128xf32, #tpu.memory_space<vmem>>, vector<1x128xf32>
    %194 = vector.broadcast %193 : vector<1x128xf32> to vector<8x128xf32>
    %195 = arith.addf %192, %194 : vector<8x128xf32>
    %c0_65 = arith.constant 0 : index
    %c0_66 = arith.constant 0 : index
    %196 = vector.load %arg9[%c0_65, %c0_66] : memref<8x128xf32, #tpu.memory_space<vmem>>, vector<8x128xf32>
    tpu.vector_store %arg9[%c0_65, %c0_66], %195 {strides = array<i32>} : memref<8x128xf32, #tpu.memory_space<vmem>>, vector<8x128xf32>,
    return
  }
  func.func @transform_0(%arg0: i32) -> i32 {
    %c0_i32 = arith.constant 0 : i32
    %c0_i32_0 = arith.constant 0 : i32
    return %c0_i32 : i32
  }
  func.func @transform_1(%arg0: i32) -> (i32, i32) {
    %c0_i32 = arith.constant 0 : i32
    %c0_i32_0 = arith.constant 0 : i32
    return %arg0, %c0_i32 : i32, i32
  }
  func.func @transform_2(%arg0: i32) -> (i32, i32) {
    %c0_i32 = arith.constant 0 : i32
    %c0_i32_0 = arith.constant 0 : i32
    %c0_i32_1 = arith.constant 0 : i32
    return %c0_i32, %c0_i32_0 : i32, i32
  }
  func.func @transform_3(%arg0: i32) -> (i32, i32) {
    %c0_i32 = arith.constant 0 : i32
    %c0_i32_0 = arith.constant 0 : i32
    %c0_i32_1 = arith.constant 0 : i32
    return %c0_i32, %c0_i32_0 : i32, i32
  }
  func.func @transform_4(%arg0: i32) -> (i32, i32) {
    %c0_i32 = arith.constant 0 : i32
    %c0_i32_0 = arith.constant 0 : i32
    %c0_i32_1 = arith.constant 0 : i32
    return %c0_i32, %c0_i32_0 : i32, i32
  }
  func.func @transform_5(%arg0: i32) -> (i32, i32) {
    %c0_i32 = arith.constant 0 : i32
    %c0_i32_0 = arith.constant 0 : i32
    %c0_i32_1 = arith.constant 0 : i32
    return %c0_i32, %c0_i32_0 : i32, i32
  }
  func.func @transform_6(%arg0: i32) -> (i32, i32) {
    %c0_i32 = arith.constant 0 : i32
    %c0_i32_0 = arith.constant 0 : i32
    %c0_i32_1 = arith.constant 0 : i32
    return %c0_i32, %c0_i32_0 : i32, i32
  }
  func.func @transform_7(%arg0: i32) -> (i32, i32) {
    %c0_i32 = arith.constant 0 : i32
    %c0_i32_0 = arith.constant 0 : i32
    %c0_i32_1 = arith.constant 0 : i32
    return %c0_i32, %c0_i32_0 : i32, i32
  }
  func.func @transform_8(%arg0: i32) -> (i32, i32) {
    %c0_i32 = arith.constant 0 : i32
    %c0_i32_0 = arith.constant 0 : i32
    return %arg0, %c0_i32 : i32, i32
  }
}

</mosaic_0001>

<bundles_post_ra>
// kernel: classifier_forward.1
= control target key start
LH: loop header
LB: loop body
LE: loop exit
PB: predicated region body
PF: predicated region fallthrough
CT: control target
= control target key end

     0   :  { %13 = vsyncpa [#allocation5], 0  ;;  %s1084_s0 = inlined_call_operand.vmem [shape: f32[2], index: 0, kind: input, shape index: {}]   ;;  %s1085_s1 = inlined_call_operand.vmem [shape: f32[64,16], index: 1, kind: input, shape index: {}]   ;;  %s1086_s2 = inlined_call_operand.vmem [shape: f32[16,128], index: 2, kind: input, shape index: {}]   ;;  %s1087_s3 = inlined_call_operand.vmem [shape: f32[128,128], index: 3, kind: input, shape index: {}]   ;;  %s1088_s4 = inlined_call_operand.vmem [shape: f32[1,128], index: 4, kind: input, shape index: {}]   ;;  %s1089_s5 = inlined_call_operand.vmem [shape: f32[1,128], index: 5, kind: input, shape index: {}]   ;;  %s1090_s6 = inlined_call_operand.hbm [shape: f32[128,128], index: 6, kind: input, shape index: {}]   ;;  %s1091_s7 = inlined_call_operand.vmem [shape: f32[1,128], index: 7, kind: input, shape index: {}]   ;;  %s1092_s8 = inlined_call_operand.vmem [shape: f32[8,128], index: 8, kind: output, shape index: {}]  }
   0x1   :  { %s20_s29 = sshll.u32 %s1084_s0, 4  ;;  %s21_s29 = int_to_ptr.vmem [resolvable:$true] %s20_s29 }
   0x2   :  { %14 = vsyncpa [#allocation4], 0  ;;  %s38_s10 = sshll.u32 %s1090_s6, 4  ;;  %s730_s11 = smov [#allocation3]   ;;  %s39_s10 = int_to_ptr.hbm [resolvable:$true] %s38_s10 }
   0x3   :  { %23 = dma.vmem_to_smem %s21_s29, 16, %s730_s11, [#allocation5]  }
   0x4   :  { %s731_s12 = smov [#allocation6]   ;;  %s732_s14 = smov 128  }
   0x5   :  { %s40_s13 = sshll.u32 %s731_s12, 4  ;;  %s733_s15 = smov 8   ;;  %s41_s13 = int_to_ptr.vmem [resolvable:$true] %s40_s13 }
   0x6   :  { %46 = dma.hbm_to_vmem [thread:$0]  %s39_s10, 2048, %s41_s13, [#allocation4], %s732_s14, %s732_s14, %s733_s15  }
   0x7   :  { %726 = dma.done.wait [#allocation5], 16  }
   0x8   :  { %727 = vsyncadd [#allocation5], 4294967280 }
   0x9   :  { %728 = dma.done.wait [#allocation4], 2048  }
   0xa   :  { %729 = vsyncadd [#allocation4], 4294965248 }
   0xb   :  { %57 = sfence }
   0xc   :  { %v789_v0 = vld [vmem:[%s1087_s3 + $0x78] sm:$0xff]  ;;  %v794_v1 = vld [vmem:[%s1087_s3 + $0x70] sm:$0xff]  ;;  %v801_v2 = vld [vmem:[%s1087_s3 + $0x68] sm:$0xff]  ;;  %vm71_vm0 = vcmask 130048   ;;  %v734_v19 = vmov 0.0   ;;  %s58_s30 = sld [smem:[#allocation3]] }
   0xd   :  { %170 = vmatpush.msra.mxu1 %v789_v0  ;;  %222 = vmatpush.msra.mxu2 %v789_v0  ;;  %v809_v3 = vld [vmem:[%s1087_s3 + $0x60] sm:$0xff]  ;;  %v70_v4 = vld [vmem:[%s1086_s2 + $0x8] sm:$0xff]  ;;  %v819_v5 = vld [vmem:[%s1087_s3 + $0x58] sm:$0xff]  ;;  %s617_s9 = sld [smem:[#allocation3 + $0x1]] }
   0xe   :  { %272 = vmatpush.msra.mxu3 %v789_v0  ;;  %110 = vmatpush.msra.mxu0 %v70_v4  ;;  %v69_v6 = vld [vmem:[%s1086_s2] sm:$0xff]  ;;  %v833_v8 = vld [vmem:[%s1087_s3 + $0x50] sm:$0xff]  ;;  %v842_v9 = vld [vmem:[%s1087_s3 + $0x48] sm:$0xff] }
   0xf   :  { %171 = vmatpush.msra.mxu1 %v794_v1  ;;  %223 = vmatpush.msra.mxu2 %v794_v1  ;;  %v61_v7 = vld [vmem:[%s1085_s1] sm:$0xff]  ;;  %v860_v11 = vld [vmem:[%s1087_s3 + $0x38] sm:$0xff]  ;;  %v869_v12 = vld [vmem:[%s1087_s3 + $0x30] sm:$0xff] }
  0x10   :  { %273 = vmatpush.msra.mxu3 %v794_v1  ;;  %111 = vmatpush.msra.mxu0 %v69_v6  ;;  %v851_v10 = vld [vmem:[%s1087_s3 + $0x40] sm:$0xff]  ;;  %v878_v13 = vld [vmem:[%s1087_s3 + $0x28] sm:$0xff]  ;;  %v896_v15 = vld [vmem:[%s1087_s3 + $0x18] sm:$0xff] }
  0x11   :  { %172 = vmatpush.msra.mxu1 %v801_v2  ;;  %224 = vmatpush.msra.mxu2 %v801_v2  ;;  %v887_v14 = vld [vmem:[%s1087_s3 + $0x20] sm:$0xff]  ;;  %v905_v16 = vld [vmem:[%s1087_s3 + $0x10] sm:$0xff]  ;;  %v914_v17 = vld [vmem:[%s1087_s3 + $0x8] sm:$0xff] }
  0x12   :  { %274 = vmatpush.msra.mxu3 %v801_v2  ;;  %618 = vmatmul.msk.f32.vlgmr.msra.gmra.mxu0 %vm71_vm0, %v61_v7  ;;  %v923_v18 = vld [vmem:[%s1087_s3] sm:$0xff]  ;;  %v62_v26 = vld [vmem:[%s1085_s1 + $0x8] sm:$0xff]  ;;  %v1020_v39 = vstv %s58_s30  ;;  %v63_v54 = vld [vmem:[%s1085_s1 + $0x10] sm:$0xff] }
  0x13   :  { %173 = vmatpush.msra.mxu1 %v809_v3  ;;  %225 = vmatpush.msra.mxu2 %v809_v3  ;;  %v1007_v21 = vld [vmem:[%s1088_s4] ss:$0 sm:$0xff]  ;;  %s60_s10 = sadd.f32 %s617_s9, %s58_s30 }
  0x14   :  { %275 = vmatpush.msra.mxu3 %v809_v3  ;;  %472 = vmatpush.msrb.mxu0 %v789_v0  ;;  %v1017_v30 = vld [vmem:[%s1089_s5] ss:$0 sm:$0xff] }
  0x15   :  { %174 = vmatpush.msra.mxu1 %v819_v5  ;;  %226 = vmatpush.msra.mxu2 %v819_v5  ;;  %v1022_v42 = vstv %s60_s10 }
  0x16   :  { %276 = vmatpush.msra.mxu3 %v819_v5  ;;  %473 = vmatpush.msrb.mxu0 %v794_v1 }
  0x17   :  { %175 = vmatpush.msra.mxu1 %v833_v8  ;;  %227 = vmatpush.msra.mxu2 %v833_v8 }
  0x18   :  { %277 = vmatpush.msra.mxu3 %v833_v8  ;;  %474 = vmatpush.msrb.mxu0 %v801_v2 }
  0x19   :  { %176 = vmatpush.msra.mxu1 %v842_v9  ;;  %228 = vmatpush.msra.mxu2 %v842_v9 }
  0x1a   :  { %278 = vmatpush.msra.mxu3 %v842_v9  ;;  %475 = vmatpush.msrb.mxu0 %v809_v3 }
  0x1b   :  { %177 = vmatpush.msra.mxu1 %v851_v10  ;;  %229 = vmatpush.msra.mxu2 %v851_v10 }
  0x1c   :  { %279 = vmatpush.msra.mxu3 %v851_v10  ;;  %476 = vmatpush.msrb.mxu0 %v819_v5 }
  0x1d   :  { %178 = vmatpush.msra.mxu1 %v860_v11  ;;  %230 = vmatpush.msra.mxu2 %v860_v11 }
  0x1e   :  { %280 = vmatpush.msra.mxu3 %v860_v11  ;;  %477 = vmatpush.msrb.mxu0 %v833_v8 }
  0x1f   :  { %179 = vmatpush.msra.mxu1 %v869_v12  ;;  %231 = vmatpush.msra.mxu2 %v869_v12 }
  0x20   :  { %281 = vmatpush.msra.mxu3 %v869_v12  ;;  %478 = vmatpush.msrb.mxu0 %v842_v9 }
  0x21   :  { %180 = vmatpush.msra.mxu1 %v878_v13  ;;  %232 = vmatpush.msra.mxu2 %v878_v13 }
  0x22   :  { %282 = vmatpush.msra.mxu3 %v878_v13  ;;  %479 = vmatpush.msrb.mxu0 %v851_v10 }
  0x23   :  { %181 = vmatpush.msra.mxu1 %v887_v14  ;;  %233 = vmatpush.msra.mxu2 %v887_v14 }
  0x24   :  { %283 = vmatpush.msra.mxu3 %v887_v14  ;;  %480 = vmatpush.msrb.mxu0 %v860_v11 }
  0x25   :  { %182 = vmatpush.msra.mxu1 %v896_v15  ;;  %234 = vmatpush.msra.mxu2 %v896_v15 }
  0x26   :  { %284 = vmatpush.msra.mxu3 %v896_v15  ;;  %481 = vmatpush.msrb.mxu0 %v869_v12 }
  0x27   :  { %183 = vmatpush.msra.mxu1 %v905_v16  ;;  %235 = vmatpush.msra.mxu2 %v905_v16 }
  0x28   :  { %285 = vmatpush.msra.mxu3 %v905_v16  ;;  %482 = vmatpush.msrb.mxu0 %v878_v13 }
  0x29   :  { %184 = vmatpush.msra.mxu1 %v914_v17  ;;  %236 = vmatpush.msra.mxu2 %v914_v17 }
  0x2a   :  { %286 = vmatpush.msra.mxu3 %v914_v17  ;;  %483 = vmatpush.msrb.mxu0 %v887_v14 }
  0x2b   :  { %185 = vmatpush.msra.mxu1 %v923_v18  ;;  %237 = vmatpush.msra.mxu2 %v923_v18 }
  0x2c   :  { %186 = vmatmul.f32.vlgmr.msra.gmra.mxu1 %v734_v19  ;;  %287 = vmatpush.msra.mxu3 %v923_v18 }
  0x2d   :  { %322 = vmatpush.msrb.mxu1 %v789_v0  ;;  %372 = vmatpush.msrb.mxu2 %v789_v0 }
  0x2e   :  { %422 = vmatpush.msrb.mxu3 %v789_v0  ;;  %484 = vmatpush.msrb.mxu0 %v896_v15 }
  0x2f   :  { %323 = vmatpush.msrb.mxu1 %v794_v1  ;;  %373 = vmatpush.msrb.mxu2 %v794_v1 }
  0x30   :  { %423 = vmatpush.msrb.mxu3 %v794_v1  ;;  %485 = vmatpush.msrb.mxu0 %v905_v16 }
  0x31   :  { %324 = vmatpush.msrb.mxu1 %v801_v2  ;;  %374 = vmatpush.msrb.mxu2 %v801_v2 }
  0x32   :  { %424 = vmatpush.msrb.mxu3 %v801_v2  ;;  %486 = vmatpush.msrb.mxu0 %v914_v17 }
  0x33   :  { %325 = vmatpush.msrb.mxu1 %v809_v3  ;;  %375 = vmatpush.msrb.mxu2 %v809_v3 }
  0x34   :  { %425 = vmatpush.msrb.mxu3 %v809_v3  ;;  %487 = vmatpush.msrb.mxu0 %v923_v18 }
  0x35   :  { %326 = vmatpush.msrb.mxu1 %v819_v5  ;;  %376 = vmatpush.msrb.mxu2 %v819_v5 }
  0x36   :  { %426 = vmatpush.msrb.mxu3 %v819_v5  ;;  %619 = vmatmul.msk.f32.gmra.mxu0 %vm71_vm0, %v62_v26 }
  0x37   :  { %327 = vmatpush.msrb.mxu1 %v833_v8  ;;  %377 = vmatpush.msrb.mxu2 %v833_v8 }
  0x38   :  { %427 = vmatpush.msrb.mxu3 %v833_v8 }
  0x39   :  { %328 = vmatpush.msrb.mxu1 %v842_v9  ;;  %378 = vmatpush.msrb.mxu2 %v842_v9 }
  0x3a   :  { %428 = vmatpush.msrb.mxu3 %v842_v9 }
  0x3b   :  { %329 = vmatpush.msrb.mxu1 %v851_v10  ;;  %379 = vmatpush.msrb.mxu2 %v851_v10 }
  0x3c   :  { %429 = vmatpush.msrb.mxu3 %v851_v10 }
  0x3d   :  { %330 = vmatpush.msrb.mxu1 %v860_v11  ;;  %380 = vmatpush.msrb.mxu2 %v860_v11 }
  0x3e   :  { %430 = vmatpush.msrb.mxu3 %v860_v11  ;;  %620 = vmatmul.msk.f32.gmra.mxu0 %vm71_vm0, %v63_v54 }
  0x3f   :  { %331 = vmatpush.msrb.mxu1 %v869_v12  ;;  %381 = vmatpush.msrb.mxu2 %v869_v12 }
  0x40   :  { %431 = vmatpush.msrb.mxu3 %v869_v12 }
  0x41   :  { %332 = vmatpush.msrb.mxu1 %v878_v13  ;;  %382 = vmatpush.msrb.mxu2 %v878_v13 }
  0x42   :  { %432 = vmatpush.msrb.mxu3 %v878_v13 }
  0x43   :  { %333 = vmatpush.msrb.mxu1 %v887_v14  ;;  %383 = vmatpush.msrb.mxu2 %v887_v14 }
  0x44   :  { %433 = vmatpush.msrb.mxu3 %v887_v14 }
  0x45   :  { %334 = vmatpush.msrb.mxu1 %v896_v15  ;;  %384 = vmatpush.msrb.mxu2 %v896_v15 }
  0x46   :  { %434 = vmatpush.msrb.mxu3 %v896_v15 }
  0x47   :  { %335 = vmatpush.msrb.mxu1 %v905_v16  ;;  %385 = vmatpush.msrb.mxu2 %v905_v16 }
  0x48   :  { %435 = vmatpush.msrb.mxu3 %v905_v16 }
  0x49   :  { %336 = vmatpush.msrb.mxu1 %v914_v17  ;;  %386 = vmatpush.msrb.mxu2 %v914_v17 }
  0x4a   :  { %436 = vmatpush.msrb.mxu3 %v914_v17 }
  0x4b   :  { %337 = vmatpush.msrb.mxu1 %v923_v18  ;;  %387 = vmatpush.msrb.mxu2 %v923_v18 }
  0x4c   :  { %437 = vmatpush.msrb.mxu3 %v923_v18 }
  0x4d   :  { %522 = vmatpush.msra.mxu1 %v789_v0 }
  0x4f   :  { %523 = vmatpush.msra.mxu1 %v794_v1 }
  0x51   :  { %524 = vmatpush.msra.mxu1 %v801_v2 }
  0x53   :  { %525 = vmatpush.msra.mxu1 %v809_v3 }
  0x55   :  { %526 = vmatpush.msra.mxu1 %v819_v5 }
  0x57   :  { %527 = vmatpush.msra.mxu1 %v833_v8 }
  0x59   :  { %528 = vmatpush.msra.mxu1 %v842_v9 }
  0x5b   :  { %529 = vmatpush.msra.mxu1 %v851_v10  ;;  %v64_v10 = vld [vmem:[%s1085_s1 + $0x18] sm:$0xff] }
  0x5c   :  { %621 = vmatmul.msk.f32.gmra.mxu0 %vm71_vm0, %v64_v10 }
  0x5d   :  { %530 = vmatpush.msra.mxu1 %v860_v11 }
  0x5f   :  { %531 = vmatpush.msra.mxu1 %v869_v12 }
  0x61   :  { %532 = vmatpush.msra.mxu1 %v878_v13 }
  0x63   :  { %533 = vmatpush.msra.mxu1 %v887_v14 }
  0x65   :  { %534 = vmatpush.msra.mxu1 %v896_v15 }
  0x67   :  { %535 = vmatpush.msra.mxu1 %v905_v16 }
  0x69   :  { %536 = vmatpush.msra.mxu1 %v914_v17 }
  0x6b   :  { %537 = vmatpush.msra.mxu1 %v923_v18 }
  0x8f   :  { %v113_v20 = vpop.f32.mrf.mxu0 }
  0xa9   :  { %v187_v22 = vpop.f32.mrf.mxu1 }
  0xaa   :  { %v190_v23 = vadd.f32 %v187_v22, %v113_v20 }
  0xac   :  { %v191_v24 = vadd.f32 %v1007_v21, %v190_v23  ;;  %v211_v33 = vadd.f32 %v1017_v30, %v190_v23 }
  0xae   :  { %v626_v25 = vmul.f32 -1.442695, %v191_v24 }
  0xb0   :  { %642 = vpow2.f32 %v626_v25 }
  0xb3   :  { %v116_v49 = vpop.f32.mrf.mxu0 }
  0xb6   :  { %v643_v27 = vpop.eup %642 }
  0xb7   :  { %v195_v28 = vadd.f32 1.0, %v643_v27 }
  0xb9   :  { %644 = vrcp.f32 %v195_v28  ;;  %v207_v34 = vand.u32 2147483648, %v195_v28  ;;  %v205_v36 = vand.u32 2147483647, %v195_v28  ;;  %vm201_vm2 = vweird.f32 %v195_v28 }
  0xba   :  { %646 = vtanh.f32 %v211_v33 }
  0xbb   :  { %v208_v38 = vor.u32 1.1754944e-38, %v207_v34  ;;  %vm206_vm4 = vcmp.eq.f32.partialorder %v205_v36, 8.507059e+37  ;;  %v119_v11 = vpop.f32.mrf.mxu0 }
  0xbf   :  { %v645_v29 = vpop.eup %644 }
  0xc0   :  { %v197_v31 = vmul.f32 %v645_v29, %v195_v28  ;;  %vm202_vm1 = vweird.f32 %v645_v29  ;;  %v647_v45 = vpop.eup %646 }
  0xc1   :  { %vm203_vm3 = vmor %vm201_vm2, %vm202_vm1 }
  0xc2   :  { %v198_v32 = vsub.f32 1.0, %v197_v31 }
  0xc4   :  { %v199_v35 = vmul.f32 %v645_v29, %v198_v32 }
  0xc6   :  { %v200_v37 = vadd.f32 %v645_v29, %v199_v35 }
  0xc8   :  { %v204_v40 = vsel %vm203_vm3, %v645_v29, %v200_v37 }
  0xc9   :  { %v209_v41 = vsel %vm206_vm4, %v208_v38, %v204_v40 }
  0xca   :  { %v214_v43 = vmul.f32 %v1020_v39, %v209_v41  ;;  %v218_v47 = vmul.f32 0.0, %v209_v41 }
  0xcc   :  { %v216_v44 = vsub.f32 %v1022_v42, %v214_v43 }
  0xce   :  { %v217_v46 = vmul.f32 %v647_v45, %v216_v44  ;;  %v65_v44 = vld [vmem:[%s1085_s1 + $0x20] sm:$0xff] }
  0xcf   :  { %622 = vmatmul.msk.f32.gmra.mxu0 %vm71_vm0, %v65_v44 }
  0xd0   :  { %v219_v48 = vadd.f32 %v218_v47, %v217_v46 }
  0xd2   :  { %238 = vmatmul.f32.vlgmr.msra.gmra.mxu2 %v219_v48 }
  0xd9   :  { %v122_v37 = vpop.f32.mrf.mxu0 }
 0x155   :  { %v239_v50 = vpop.f32.mrf.mxu2 }
 0x156   :  { %v242_v51 = vadd.f32 %v239_v50, %v116_v49 }
 0x158   :  { %v243_v52 = vadd.f32 %v1007_v21, %v242_v51  ;;  %v263_v60 = vadd.f32 %v1017_v30, %v242_v51 }
 0x15a   :  { %v627_v53 = vmul.f32 -1.442695, %v243_v52 }
 0x15c   :  { %648 = vpow2.f32 %v627_v53 }
 0x162   :  { %v649_v55 = vpop.eup %648 }
 0x163   :  { %v247_v56 = vadd.f32 1.0, %v649_v55 }
 0x165   :  { %650 = vrcp.f32 %v247_v56  ;;  %v259_v61 = vand.u32 2147483648, %v247_v56  ;;  %v257_v63 = vand.u32 2147483647, %v247_v56  ;;  %vm253_vm6 = vweird.f32 %v247_v56 }
 0x166   :  { %652 = vtanh.f32 %v263_v60 }
 0x167   :  { %v260_v1 = vor.u32 1.1754944e-38, %v259_v61  ;;  %vm258_vm8 = vcmp.eq.f32.partialorder %v257_v63, 8.507059e+37 }
 0x16b   :  { %v651_v57 = vpop.eup %650 }
 0x16c   :  { %v249_v58 = vmul.f32 %v651_v57, %v247_v56  ;;  %vm254_vm5 = vweird.f32 %v651_v57  ;;  %v653_v6 = vpop.eup %652 }
 0x16d   :  { %vm255_vm7 = vmor %vm253_vm6, %vm254_vm5 }
 0x16e   :  { %v250_v59 = vsub.f32 1.0, %v249_v58 }
 0x170   :  { %v251_v62 = vmul.f32 %v651_v57, %v250_v59 }
 0x172   :  { %v252_v0 = vadd.f32 %v651_v57, %v251_v62 }
 0x174   :  { %v256_v2 = vsel %vm255_vm7, %v651_v57, %v252_v0  ;;  %v125_v0 = vpop.f32.mrf.mxu0 }
 0x175   :  { %v261_v3 = vsel %vm258_vm8, %v260_v1, %v256_v2 }
 0x176   :  { %v265_v4 = vmul.f32 %v261_v3, %v1020_v39  ;;  %v268_v8 = vmul.f32 %v261_v3, %v219_v48 }
 0x178   :  { %v266_v5 = vsub.f32 %v1022_v42, %v265_v4 }
 0x17a   :  { %v267_v7 = vmul.f32 %v653_v6, %v266_v5  ;;  %v66_v5 = vld [vmem:[%s1085_s1 + $0x28] sm:$0xff] }
 0x17b   :  { %623 = vmatmul.msk.f32.gmra.mxu0 %vm71_vm0, %v66_v5 }
 0x17c   :  { %v269_v9 = vadd.f32 %v268_v8, %v267_v7 }
 0x17e   :  { %288 = vmatmul.f32.vlgmr.msra.gmra.mxu3 %v269_v9 }
 0x201   :  { %v289_v12 = vpop.f32.mrf.mxu3 }
 0x202   :  { %v292_v13 = vadd.f32 %v289_v12, %v119_v11 }
 0x204   :  { %v293_v14 = vadd.f32 %v1007_v21, %v292_v13  ;;  %v313_v22 = vadd.f32 %v1017_v30, %v292_v13 }
 0x206   :  { %v628_v15 = vmul.f32 -1.442695, %v293_v14 }
 0x208   :  { %654 = vpow2.f32 %v628_v15 }
 0x20e   :  { %v655_v16 = vpop.eup %654 }
 0x20f   :  { %v297_v17 = vadd.f32 1.0, %v655_v16 }
 0x211   :  { %656 = vrcp.f32 %v297_v17  ;;  %v309_v23 = vand.u32 2147483648, %v297_v17  ;;  %v307_v25 = vand.u32 2147483647, %v297_v17  ;;  %vm303_vm10 = vweird.f32 %v297_v17 }
 0x212   :  { %658 = vtanh.f32 %v313_v22 }
 0x213   :  { %v310_v27 = vor.u32 1.1754944e-38, %v309_v23  ;;  %vm308_vm12 = vcmp.eq.f32.partialorder %v307_v25, 8.507059e+37 }
 0x217   :  { %v657_v18 = vpop.eup %656 }
 0x218   :  { %v299_v19 = vmul.f32 %v657_v18, %v297_v17  ;;  %vm304_vm9 = vweird.f32 %v657_v18  ;;  %v659_v33 = vpop.eup %658 }
 0x219   :  { %vm305_vm11 = vmor %vm303_vm10, %vm304_vm9 }
 0x21a   :  { %v300_v20 = vsub.f32 1.0, %v299_v19 }
 0x21c   :  { %v301_v24 = vmul.f32 %v657_v18, %v300_v20 }
 0x21e   :  { %v302_v26 = vadd.f32 %v657_v18, %v301_v24 }
 0x220   :  { %v306_v28 = vsel %vm305_vm11, %v657_v18, %v302_v26  ;;  %v67_v26 = vld [vmem:[%s1085_s1 + $0x30] sm:$0xff] }
 0x221   :  { %v311_v29 = vsel %vm308_vm12, %v310_v27, %v306_v28  ;;  %624 = vmatmul.msk.f32.gmra.mxu0 %vm71_vm0, %v67_v26  ;;  %v68_v27 = vld [vmem:[%s1085_s1 + $0x38] sm:$0xff]  ;;  %v128_v28 = vpop.f32.mrf.mxu0  ;;  %v576_v26 = vld [vmem:[#allocation6 + $0x30] sm:$0xff] }
 0x222   :  { %v315_v31 = vmul.f32 %v311_v29, %v1020_v39  ;;  %v318_v35 = vmul.f32 %v311_v29, %v269_v9 }
 0x224   :  { %v316_v32 = vsub.f32 %v1022_v42, %v315_v31 }
 0x226   :  { %v317_v34 = vmul.f32 %v659_v33, %v316_v32 }
 0x228   :  { %v319_v36 = vadd.f32 %v318_v35, %v317_v34 }
 0x229   :  { %625 = vmatmul.msk.f32.gmra.mxu0 %vm71_vm0, %v68_v27  ;;  %v575_v27 = vld [vmem:[#allocation6 + $0x28] sm:$0xff] }
 0x22a   :  { %338 = vmatmul.f32.vlgmr.msrb.gmra.mxu1 %v319_v36 }
 0x2a7   :  { %v339_v38 = vpop.f32.mrf.mxu1 }
 0x2a8   :  { %v342_v40 = vadd.f32 %v339_v38, %v122_v37 }
 0x2aa   :  { %v343_v41 = vadd.f32 %v1007_v21, %v342_v40  ;;  %v363_v50 = vadd.f32 %v1017_v30, %v342_v40 }
 0x2ac   :  { %v629_v43 = vmul.f32 -1.442695, %v343_v41 }
 0x2ae   :  { %660 = vpow2.f32 %v629_v43 }
 0x2b4   :  { %v661_v45 = vpop.eup %660 }
 0x2b5   :  { %v347_v46 = vadd.f32 1.0, %v661_v45 }
 0x2b7   :  { %662 = vrcp.f32 %v347_v46  ;;  %v359_v51 = vand.u32 2147483648, %v347_v46  ;;  %v357_v53 = vand.u32 2147483647, %v347_v46  ;;  %vm353_vm14 = vweird.f32 %v347_v46 }
 0x2b8   :  { %664 = vtanh.f32 %v363_v50 }
 0x2b9   :  { %v360_v55 = vor.u32 1.1754944e-38, %v359_v51  ;;  %vm358_vm1 = vcmp.eq.f32.partialorder %v357_v53, 8.507059e+37 }
 0x2bd   :  { %v663_v47 = vpop.eup %662 }
 0x2be   :  { %v349_v48 = vmul.f32 %v663_v47, %v347_v46  ;;  %vm354_vm13 = vweird.f32 %v663_v47  ;;  %v665_v60 = vpop.eup %664 }
 0x2bf   :  { %vm355_vm15 = vmor %vm353_vm14, %vm354_vm13 }
 0x2c0   :  { %v350_v49 = vsub.f32 1.0, %v349_v48 }
 0x2c2   :  { %v351_v52 = vmul.f32 %v663_v47, %v350_v49 }
 0x2c4   :  { %v352_v54 = vadd.f32 %v663_v47, %v351_v52 }
 0x2c6   :  { %v356_v56 = vsel %vm355_vm15, %v663_v47, %v352_v54 }
 0x2c7   :  { %v361_v57 = vsel %vm358_vm1, %v360_v55, %v356_v56  ;;  %v131_v55 = vpop.f32.mrf.mxu0 }
 0x2c8   :  { %v365_v58 = vmul.f32 %v361_v57, %v1020_v39  ;;  %v368_v62 = vmul.f32 %v361_v57, %v319_v36 }
 0x2ca   :  { %v366_v59 = vsub.f32 %v1022_v42, %v365_v58 }
 0x2cc   :  { %v367_v61 = vmul.f32 %v665_v60, %v366_v59 }
 0x2ce   :  { %v369_v63 = vadd.f32 %v368_v62, %v367_v61 }
 0x2cf   :  { %v134_v56 = vpop.f32.mrf.mxu0 }
 0x2d0   :  { %388 = vmatmul.f32.vlgmr.msrb.gmra.mxu2 %v369_v63 }
 0x353   :  { %v389_v1 = vpop.f32.mrf.mxu2 }
 0x354   :  { %v392_v2 = vadd.f32 %v389_v1, %v125_v0 }
 0x356   :  { %v393_v3 = vadd.f32 %v1007_v21, %v392_v2  ;;  %v413_v11 = vadd.f32 %v1017_v30, %v392_v2 }
 0x358   :  { %v630_v4 = vmul.f32 -1.442695, %v393_v3 }
 0x35a   :  { %666 = vpow2.f32 %v630_v4 }
 0x360   :  { %v667_v6 = vpop.eup %666 }
 0x361   :  { %v397_v7 = vadd.f32 1.0, %v667_v6 }
 0x363   :  { %668 = vrcp.f32 %v397_v7  ;;  %v409_v12 = vand.u32 2147483648, %v397_v7  ;;  %v407_v14 = vand.u32 2147483647, %v397_v7  ;;  %vm403_vm3 = vweird.f32 %v397_v7 }
 0x364   :  { %670 = vtanh.f32 %v413_v11 }
 0x365   :  { %v410_v16 = vor.u32 1.1754944e-38, %v409_v12  ;;  %vm408_vm5 = vcmp.eq.f32.partialorder %v407_v14, 8.507059e+37 }
 0x369   :  { %v669_v8 = vpop.eup %668 }
 0x36a   :  { %v399_v9 = vmul.f32 %v669_v8, %v397_v7  ;;  %vm404_vm2 = vweird.f32 %v669_v8  ;;  %v671_v22 = vpop.eup %670 }
 0x36b   :  { %vm405_vm4 = vmor %vm403_vm3, %vm404_vm2 }
 0x36c   :  { %v400_v10 = vsub.f32 1.0, %v399_v9 }
 0x36e   :  { %v401_v13 = vmul.f32 %v669_v8, %v400_v10 }
 0x370   :  { %v402_v15 = vadd.f32 %v669_v8, %v401_v13 }
 0x372   :  { %v406_v17 = vsel %vm405_vm4, %v669_v8, %v402_v15 }
 0x373   :  { %v411_v18 = vsel %vm408_vm5, %v410_v16, %v406_v17  ;;  %v585_v16 = vld [vmem:[#allocation6 + $0x78] sm:$0xff]  ;;  %v584_v17 = vld [vmem:[#allocation6 + $0x70] sm:$0xff] }
 0x374   :  { %v415_v19 = vmul.f32 %v411_v18, %v1020_v39  ;;  %v418_v24 = vmul.f32 %v411_v18, %v369_v63  ;;  %590 = vmatpush.msra.mxu2 %v585_v16  ;;  %v583_v18 = vld [vmem:[#allocation6 + $0x68] sm:$0xff] }
 0x376   :  { %v416_v20 = vsub.f32 %v1022_v42, %v415_v19  ;;  %591 = vmatpush.msra.mxu2 %v584_v17  ;;  %v582_v19 = vld [vmem:[#allocation6 + $0x60] sm:$0xff] }
 0x378   :  { %v417_v23 = vmul.f32 %v671_v22, %v416_v20  ;;  %592 = vmatpush.msra.mxu2 %v583_v18  ;;  %v581_v20 = vld [vmem:[#allocation6 + $0x58] sm:$0xff]  ;;  %v580_v22 = vld [vmem:[#allocation6 + $0x50] sm:$0xff] }
 0x37a   :  { %v419_v25 = vadd.f32 %v418_v24, %v417_v23  ;;  %593 = vmatpush.msra.mxu2 %v582_v19  ;;  %v579_v23 = vld [vmem:[#allocation6 + $0x48] sm:$0xff]  ;;  %v578_v24 = vld [vmem:[#allocation6 + $0x40] sm:$0xff] }
 0x37c   :  { %438 = vmatmul.f32.vlgmr.msrb.gmra.mxu3 %v419_v25  ;;  %594 = vmatpush.msra.mxu2 %v581_v20 }
 0x37e   :  { %595 = vmatpush.msra.mxu2 %v580_v22 }
 0x380   :  { %596 = vmatpush.msra.mxu2 %v579_v23 }
 0x382   :  { %597 = vmatpush.msra.mxu2 %v578_v24 }
 0x3ff   :  { %v439_v29 = vpop.f32.mrf.mxu3 }
 0x400   :  { %v442_v31 = vadd.f32 %v439_v29, %v128_v28  ;;  %v574_v28 = vld [vmem:[#allocation6 + $0x20] sm:$0xff]  ;;  %v573_v29 = vld [vmem:[#allocation6 + $0x18] sm:$0xff] }
 0x402   :  { %v443_v32 = vadd.f32 %v1007_v21, %v442_v31  ;;  %v463_v40 = vadd.f32 %v1017_v30, %v442_v31 }
 0x404   :  { %v631_v33 = vmul.f32 -1.442695, %v443_v32 }
 0x406   :  { %672 = vpow2.f32 %v631_v33  ;;  %v572_v33 = vld [vmem:[#allocation6 + $0x10] sm:$0xff] }
 0x40c   :  { %v673_v34 = vpop.eup %672 }
 0x40d   :  { %v447_v35 = vadd.f32 1.0, %v673_v34 }
 0x40f   :  { %674 = vrcp.f32 %v447_v35  ;;  %v459_v41 = vand.u32 2147483648, %v447_v35  ;;  %v457_v44 = vand.u32 2147483647, %v447_v35  ;;  %vm453_vm7 = vweird.f32 %v447_v35 }
 0x410   :  { %676 = vtanh.f32 %v463_v40 }
 0x411   :  { %v460_v46 = vor.u32 1.1754944e-38, %v459_v41  ;;  %vm458_vm8 = vcmp.eq.f32.partialorder %v457_v44, 8.507059e+37 }
 0x415   :  { %v675_v36 = vpop.eup %674 }
 0x416   :  { %v449_v37 = vmul.f32 %v675_v36, %v447_v35  ;;  %vm454_vm6 = vweird.f32 %v675_v36  ;;  %v677_v51 = vpop.eup %676  ;;  %v571_v35 = vld [vmem:[#allocation6 + $0x8] sm:$0xff] }
 0x417   :  { %vm455_vm0 = vmor %vm453_vm7, %vm454_vm6 }
 0x418   :  { %v450_v38 = vsub.f32 1.0, %v449_v37  ;;  %v570_v37 = vld [vmem:[#allocation6] sm:$0xff] }
 0x41a   :  { %v451_v43 = vmul.f32 %v675_v36, %v450_v38 }
 0x41c   :  { %v452_v45 = vadd.f32 %v675_v36, %v451_v43 }
 0x41e   :  { %v456_v47 = vsel %vm455_vm0, %v675_v36, %v452_v45 }
 0x41f   :  { %v461_v48 = vsel %vm458_vm8, %v460_v46, %v456_v47 }
 0x420   :  { %v465_v49 = vmul.f32 %v461_v48, %v1020_v39  ;;  %v468_v53 = vmul.f32 %v461_v48, %v419_v25  ;;  %v577_v25 = vld [vmem:[#allocation6 + $0x38] sm:$0xff] }
 0x421   :  { %598 = vmatpush.msra.mxu2 %v577_v25 }
 0x422   :  { %v466_v50 = vsub.f32 %v1022_v42, %v465_v49 }
 0x423   :  { %599 = vmatpush.msra.mxu2 %v576_v26 }
 0x424   :  { %v467_v52 = vmul.f32 %v677_v51, %v466_v50 }
 0x425   :  { %600 = vmatpush.msra.mxu2 %v575_v27 }
 0x426   :  { %v469_v54 = vadd.f32 %v468_v53, %v467_v52 }
 0x427   :  { %601 = vmatpush.msra.mxu2 %v574_v28 }
 0x428   :  { %488 = vmatmul.f32.vlgmr.msrb.gmra.mxu0 %v469_v54 }
 0x429   :  { %602 = vmatpush.msra.mxu2 %v573_v29 }
 0x42b   :  { %603 = vmatpush.msra.mxu2 %v572_v33 }
 0x42d   :  { %604 = vmatpush.msra.mxu2 %v571_v35 }
 0x42f   :  { %605 = vmatpush.msra.mxu2 %v570_v37 }
 0x4a5   :  { %v489_v57 = vpop.f32.mrf.mxu0 }
 0x4a6   :  { %v492_v58 = vadd.f32 %v489_v57, %v131_v55  ;;  %v641_v57 = vld [vmem:[%s1091_s7] ss:$0 sm:$0xff] }
 0x4a8   :  { %v493_v59 = vadd.f32 %v1007_v21, %v492_v58  ;;  %v513_v2 = vadd.f32 %v1017_v30, %v492_v58 }
 0x4aa   :  { %v632_v60 = vmul.f32 -1.442695, %v493_v59 }
 0x4ac   :  { %678 = vpow2.f32 %v632_v60 }
 0x4b2   :  { %v679_v61 = vpop.eup %678 }
 0x4b3   :  { %v497_v62 = vadd.f32 1.0, %v679_v61 }
 0x4b5   :  { %680 = vrcp.f32 %v497_v62  ;;  %v509_v3 = vand.u32 2147483648, %v497_v62  ;;  %v507_v5 = vand.u32 2147483647, %v497_v62  ;;  %vm503_vm10 = vweird.f32 %v497_v62 }
 0x4b6   :  { %682 = vtanh.f32 %v513_v2 }
 0x4b7   :  { %v510_v7 = vor.u32 1.1754944e-38, %v509_v3  ;;  %vm508_vm12 = vcmp.eq.f32.partialorder %v507_v5, 8.507059e+37 }
 0x4bb   :  { %v681_v63 = vpop.eup %680 }
 0x4bc   :  { %v499_v0 = vmul.f32 %v681_v63, %v497_v62  ;;  %vm504_vm9 = vweird.f32 %v681_v63  ;;  %v683_v12 = vpop.eup %682 }
 0x4bd   :  { %vm505_vm11 = vmor %vm503_vm10, %vm504_vm9 }
 0x4be   :  { %v500_v1 = vsub.f32 1.0, %v499_v0 }
 0x4c0   :  { %v501_v4 = vmul.f32 %v681_v63, %v500_v1 }
 0x4c2   :  { %v502_v6 = vadd.f32 %v681_v63, %v501_v4 }
 0x4c4   :  { %v506_v8 = vsel %vm505_vm11, %v681_v63, %v502_v6 }
 0x4c5   :  { %v511_v9 = vsel %vm508_vm12, %v510_v7, %v506_v8 }
 0x4c6   :  { %v515_v10 = vmul.f32 %v511_v9, %v1020_v39  ;;  %v518_v14 = vmul.f32 %v511_v9, %v469_v54 }
 0x4c8   :  { %v516_v11 = vsub.f32 %v1022_v42, %v515_v10 }
 0x4ca   :  { %v517_v13 = vmul.f32 %v683_v12, %v516_v11 }
 0x4cc   :  { %v519_v15 = vadd.f32 %v518_v14, %v517_v13 }
 0x4ce   :  { %538 = vmatmul.f32.vlgmr.msra.gmra.mxu1 %v519_v15 }
 0x54b   :  { %v539_v31 = vpop.f32.mrf.mxu1 }
 0x54c   :  { %v542_v32 = vadd.f32 %v539_v31, %v134_v56 }
 0x54e   :  { %v543_v34 = vadd.f32 %v1007_v21, %v542_v32  ;;  %v563_v45 = vadd.f32 %v1017_v30, %v542_v32 }
 0x550   :  { %v633_v36 = vmul.f32 -1.442695, %v543_v34 }
 0x552   :  { %684 = vpow2.f32 %v633_v36 }
 0x558   :  { %v685_v38 = vpop.eup %684 }
 0x559   :  { %v547_v40 = vadd.f32 1.0, %v685_v38 }
 0x55b   :  { %686 = vrcp.f32 %v547_v40  ;;  %v559_v46 = vand.u32 2147483648, %v547_v40  ;;  %v557_v48 = vand.u32 2147483647, %v547_v40  ;;  %vm553_vm14 = vweird.f32 %v547_v40 }
 0x55c   :  { %688 = vtanh.f32 %v563_v45 }
 0x55d   :  { %v560_v49 = vor.u32 1.1754944e-38, %v559_v46  ;;  %vm558_vm1 = vcmp.eq.f32.partialorder %v557_v48, 8.507059e+37 }
 0x561   :  { %v687_v41 = vpop.eup %686 }
 0x562   :  { %v549_v43 = vmul.f32 %v687_v41, %v547_v40  ;;  %vm554_vm13 = vweird.f32 %v687_v41  ;;  %v689_v54 = vpop.eup %688 }
 0x563   :  { %vm555_vm15 = vmor %vm553_vm14, %vm554_vm13 }
 0x564   :  { %v550_v44 = vsub.f32 1.0, %v549_v43 }
 0x566   :  { %v551_v47 = vmul.f32 %v687_v41, %v550_v44 }
 0x568   :  { %v552_v21 = vadd.f32 %v687_v41, %v551_v47 }
 0x56a   :  { %v556_v50 = vsel %vm555_vm15, %v687_v41, %v552_v21 }
 0x56b   :  { %v561_v51 = vsel %vm558_vm1, %v560_v49, %v556_v50 }
 0x56c   :  { %v565_v52 = vmul.f32 %v561_v51, %v1020_v39  ;;  %v568_v56 = vmul.f32 %v561_v51, %v519_v15 }
 0x56e   :  { %v566_v53 = vsub.f32 %v1022_v42, %v565_v52 }
 0x570   :  { %v567_v55 = vmul.f32 %v689_v54, %v566_v53 }
 0x572   :  { %v569_v30 = vadd.f32 %v568_v56, %v567_v55 }
 0x574   :  { %606 = vmatmul.f32.vlgmr.msra.gmra.mxu2 %v569_v30 }
 0x5f7   :  { %v607_v58 = vpop.f32.mrf.mxu2 }
 0x5f8   :  { %v608_v59 = vadd.f32 %v641_v57, %v607_v58 }
 0x5fa   :  { %610 = vst [vmem:[%s1092_s8] sm:$0xff] %v608_v59 }
 0x5fb   :  { %615 = vsyncpa [#allocation4], 1 }
 0x5fc   :  { %616 = vsyncpa [#allocation5], 1 }

</bundles_post_ra>
